<compile_context>
chip_gen: v5e
topology: v5e:2x2
jax: 0.10.0
libtpu: 0.0.40
codegen_flags: <defaults>
</compile_context>

<pallas_src>
import functools

import jax
import jax.numpy as jnp
from jax.experimental import pallas as pl
from jax.experimental.pallas import tpu as pltpu


def _round_up(x, m):
    return ((x + m - 1) // m) * m


def _cdiv(a, b):
    return (a + b - 1) // b


def _nn_tokenizer_kernel(x_t_ref, codes_ref, c2_ref, x2_ref, ids_ref,
                         min_val_ref, min_idx_ref, *,
                         distance_threshold, no_code_id, use_threshold, tile_c):
    """One token tile (grid axis 0, parallel) vs. one code chunk (axis 1, arbitrary).

    x_t_ref:     (D, TILE_N)   token features, transposed (tokens on lanes)
    codes_ref:   (TILE_C, D)   (-2 * codes) chunk (native dtype)
    c2_ref:      (TILE_C, 1)   ||code_j||^2 in f32, +1e30 on padded slots
    x2_ref:      (1, TILE_N)   ||x_i||^2 in f32 (only read when thresholding)
    ids_ref:     (1, TILE_N)   int32 nearest-code ids (written at last chunk)
    min_val_ref: (1, TILE_N)   running min of (||c||^2 - 2 x.c)    [VMEM scratch]
    min_idx_ref: (1, TILE_N)   running argmin (global code index)  [VMEM scratch]
    """
    j = pl.program_id(1)

    @pl.when(j == 0)
    def _init():
        min_val_ref[...] = jnp.full_like(min_val_ref, jnp.inf)
        min_idx_ref[...] = jnp.zeros_like(min_idx_ref)

    # score[c, n] = ||c||^2 - 2 x_n . c  ==  dist_sq - ||x_n||^2  (same argmin).
    # Codes on sublanes, tokens on lanes; MXU matmul with f32 accumulation.
    scores = jnp.dot(codes_ref[...], x_t_ref[...],
                     preferred_element_type=jnp.float32) + c2_ref[...]   # (TC, TN)

    # Per-token (per-lane) min/argmin over the code (sublane) axis:
    # pure VPU vreg sweeps + tiny sublane tail, no cross-lane XLU work,
    # and the (1, TILE_N) results already match the scratch layout.
    local_min = jnp.min(scores, axis=0, keepdims=True)                   # (1, TN)
    row_idx = jax.lax.broadcasted_iota(jnp.int32, scores.shape, 0)
    masked_idx = jnp.where(scores <= local_min, row_idx, tile_c)
    local_arg = jnp.min(masked_idx, axis=0, keepdims=True) + j * tile_c  # (1, TN)

    run_min = min_val_ref[...]
    run_idx = min_idx_ref[...]
    better = local_min < run_min          # strict '<': keep first-occurrence index
    min_idx_ref[...] = jnp.where(better, local_arg, run_idx)
    min_val_ref[...] = jnp.where(better, local_min, run_min)

    @pl.when(j == pl.num_programs(1) - 1)
    def _finalize():
        ids = min_idx_ref[...]                                           # (1, TN)
        if use_threshold:
            # min_j dist_sq = min_j(||c||^2 - 2 x.c) + ||x||^2
            within = (min_val_ref[...] + x2_ref[...]) <= jnp.float32(
                distance_threshold)
            ids = jnp.where(within, ids, jnp.int32(no_code_id))
        ids_ref[...] = ids


def nearest_neighbor_tokenize(x, codes_buffer, num_codes, *,
                              distance_threshold, no_code_id=-1,
                              ignore_dist_threshold=True,
                              tile_n=1024, tile_c=1024):
    """x: (B, *dims, D); codes_buffer: (max_codes, D); num_codes: python int."""
    assert num_codes > 0, "empty-codebook path (add_codes_) is stateful; not kernelized"
    assert tile_n % 128 == 0 and tile_c % 256 == 0

    B = x.shape[0]
    dims = x.shape[1:-1]
    D = x.shape[-1]

    x_flat = x.reshape(-1, D)                          # pack 'b * d'
    N = x_flat.shape[0]

    # --- codebook prep (wrapper-side, runs once per codebook) ---------------
    C = int(num_codes)
    c_round = _round_up(C, 256)                        # MXU-friendly (256-wide)
    tile_c = min(tile_c, c_round)
    c_pad = _round_up(c_round, tile_c)

    codes = codes_buffer[:C].astype(jnp.float32)
    c2 = jnp.sum(codes * codes, axis=-1)                                  # (C,)
    # +1e30 on pad slots: never wins argmin, never passes threshold. f32 only.
    c2 = jnp.pad(c2, (0, c_pad - C), constant_values=1e30)[:, None]       # (Cp, 1)
    # Fold -2 into the codebook; code axis on sublanes, feature axis last.
    codes_scaled = (codes * -2.0).astype(x.dtype)                         # exact x2
    codes_pad = jnp.zeros((c_pad, D), x.dtype).at[:C, :].set(codes_scaled)

    # --- token prep ----------------------------------------------------------
    tile_n = min(tile_n, _round_up(N, 128))            # don't over-pad tiny N
    # Keep >= 2 token tiles on the parallel axis when N allows (v7x: 2 TCs).
    if N >= 256 and _cdiv(N, tile_n) < 2:
        tile_n = max(128, _round_up(_cdiv(N, 2), 128))
    n_pad = _round_up(N, tile_n)

    # One-time wrapper transpose: tokens on lanes inside the kernel.
    x_t = jnp.zeros((D, n_pad), x.dtype).at[:, :N].set(x_flat.T)
    x2 = jnp.zeros((1, n_pad), jnp.float32).at[0, :N].set(
        jnp.sum(x_flat.astype(jnp.float32) ** 2, axis=-1))

    n_tiles = n_pad // tile_n
    c_tiles = c_pad // tile_c

    kernel = functools.partial(
        _nn_tokenizer_kernel,
        distance_threshold=float(distance_threshold),
        no_code_id=int(no_code_id),
        use_threshold=not ignore_dist_threshold,
        tile_c=tile_c,
    )

    # VMEM budget: scores intermediate dominates; keep within v7x's 64 MiB.
    itemsize = jnp.dtype(x.dtype).itemsize
    scores_bytes = tile_c * tile_n * 4
    io_bytes = 2 * (D * tile_n * itemsize        # x^T tile (double-buffered)
                    + tile_c * D * itemsize      # codes chunk
                    + tile_c * 4                 # ||c||^2 chunk
                    + tile_n * 4                 # ||x||^2 tile
                    + tile_n * 4)                # ids tile
    vmem_limit = max(32 << 20, min(3 * scores_bytes + io_bytes + (4 << 20),
                                   60 << 20))

    ids = pl.pallas_call(
        kernel,
        out_shape=jax.ShapeDtypeStruct((1, n_pad), jnp.int32),
        grid_spec=pltpu.PrefetchScalarGridSpec(
            num_scalar_prefetch=0,
            grid=(n_tiles, c_tiles),                   # code (reduction) axis last
            in_specs=[
                pl.BlockSpec((D, tile_n), lambda i, j: (0, i)),   # x^T tile (resident over j)
                pl.BlockSpec((tile_c, D), lambda i, j: (j, 0)),   # -2*codes chunk
                pl.BlockSpec((tile_c, 1), lambda i, j: (j, 0)),   # ||code||^2 chunk (f32)
                pl.BlockSpec((1, tile_n), lambda i, j: (0, i)),   # ||x||^2 tile (f32)
            ],
            out_specs=pl.BlockSpec((1, tile_n), lambda i, j: (0, i)),
            scratch_shapes=[
                pltpu.VMEM((1, tile_n), jnp.float32),  # running min
                pltpu.VMEM((1, tile_n), jnp.int32),    # running argmin
            ],
        ),
        compiler_params=pltpu.CompilerParams(
            dimension_semantics=("parallel", "arbitrary"),
            vmem_limit_bytes=vmem_limit),
    )(x_t, codes_pad, c2, x2)

    ids = ids[0, :N].reshape((B,) + dims)              # inverse pack 'b *'
    return ids


def _reference(x, codes_buffer, num_codes, *, distance_threshold, no_code_id,
               ignore_dist_threshold):
    D = x.shape[-1]
    xf = x.reshape(-1, D).astype(jnp.float32)
    c = codes_buffer[:num_codes].astype(jnp.float32)
    dist_sq = jnp.sum((xf[:, None, :] - c[None, :, :]) ** 2, axis=-1)
    ids = jnp.argmin(dist_sq, axis=-1).astype(jnp.int32)
    if not ignore_dist_threshold:
        within = jnp.any(dist_sq <= distance_threshold, axis=-1)
        ids = jnp.where(within, ids, jnp.int32(no_code_id))
    return ids.reshape(x.shape[:-1])


if __name__ == "__main__":
    key = jax.random.PRNGKey(0)
    k_x, k_c, k_x2, k_c2 = jax.random.split(key, 4)

    # ---- config 1: module-sized small example (single tile, single chunk) --
    dim = 32
    max_codes = 256
    num_codes = 64                  # pretend 64 codes have already been added
    distance_threshold = 20.0
    no_code_id = -1

    B, H, W = 2, 8, 8               # b *dims d  ->  (2, 8, 8, 32)
    x = jax.random.normal(k_x, (B, H, W, dim), dtype=jnp.float32)
    codes_buffer = jnp.zeros((max_codes, dim), jnp.float32)
    codes_buffer = codes_buffer.at[:num_codes].set(
        jax.random.normal(k_c, (num_codes, dim), dtype=jnp.float32))

    # Eval path: ignore_dist_threshold=True -> plain nearest-neighbor argmin.
    ids_eval = nearest_neighbor_tokenize(
        x, codes_buffer, num_codes,
        distance_threshold=distance_threshold, no_code_id=no_code_id,
        ignore_dist_threshold=True)
    ids_eval = jax.block_until_ready(ids_eval)

    # Thresholded path: unmatched tokens get no_code_id.
    ids_thr = nearest_neighbor_tokenize(
        x, codes_buffer, num_codes,
        distance_threshold=distance_threshold, no_code_id=no_code_id,
        ignore_dist_threshold=False)
    ids_thr = jax.block_until_ready(ids_thr)

    ref_eval = _reference(x, codes_buffer, num_codes,
                          distance_threshold=distance_threshold,
                          no_code_id=no_code_id, ignore_dist_threshold=True)
    ref_thr = _reference(x, codes_buffer, num_codes,
                         distance_threshold=distance_threshold,
                         no_code_id=no_code_id, ignore_dist_threshold=False)

    assert ids_eval.shape == (B, H, W) and ids_eval.dtype == jnp.int32
    assert bool(jnp.all(ids_eval == ref_eval))
    assert bool(jnp.all(ids_thr == ref_thr))

    # ---- config 2: exercise multi token-tile grid + multi code-chunk argmin -
    B2, H2, W2 = 2, 16, 16          # N = 512 tokens -> 2 token tiles of 256
    num_codes2 = 300                # -> c_pad = 512, 2 code chunks of 256
    x2 = jax.random.normal(k_x2, (B2, H2, W2, dim), dtype=jnp.float32)
    codes2 = jax.random.normal(k_c2, (num_codes2, dim), dtype=jnp.float32)

    ids2 = nearest_neighbor_tokenize(
        x2, codes2, num_codes2,
        distance_threshold=distance_threshold, no_code_id=no_code_id,
        ignore_dist_threshold=False, tile_n=256, tile_c=256)
    ids2 = jax.block_until_ready(ids2)
    ref2 = _reference(x2, codes2, num_codes2,
                      distance_threshold=distance_threshold,
                      no_code_id=no_code_id, ignore_dist_threshold=False)
    assert bool(jnp.all(ids2 == ref2))

    # ---- config 3: default (large) tiles with >=2 parallel token tiles ------
    ids3 = nearest_neighbor_tokenize(
        x2, codes2, num_codes2,
        distance_threshold=distance_threshold, no_code_id=no_code_id,
        ignore_dist_threshold=True)
    ids3 = jax.block_until_ready(ids3)
    ref3 = _reference(x2, codes2, num_codes2,
                      distance_threshold=distance_threshold,
                      no_code_id=no_code_id, ignore_dist_threshold=True)
    assert bool(jnp.all(ids3 == ref3))

    print("KERNEL_OK")
</pallas_src>

<mosaic_0001>
module attributes {stable_mosaic.version = 11 : i64} {
  func.func @_nn_tokenizer_kernel(%arg0: i32, %arg1: i32, %arg2: memref<32x128xf32, #tpu.memory_space<vmem>>, %arg3: memref<256x32xf32, #tpu.memory_space<vmem>>, %arg4: memref<256x1xf32, #tpu.memory_space<vmem>>, %arg5: memref<1x128xf32, #tpu.memory_space<vmem>>, %arg6: memref<1x128xi32, #tpu.memory_space<vmem>>, %arg7: memref<1x128xf32, #tpu.memory_space<vmem>>, %arg8: memref<1x128xi32, #tpu.memory_space<vmem>>) attributes {dimension_semantics = [#tpu.dimension_semantics<parallel>, #tpu.dimension_semantics<arbitrary>], iteration_bounds = array<i64: 1, 1>, scalar_prefetch = 0 : i64, scratch_operands = 2 : i64, tpu.core_type = #tpu.core_type<tc>, window_params = [{transform_indices = @transform_0, window_bounds = array<i64: 32, 128>}, {transform_indices = @transform_1, window_bounds = array<i64: 256, 32>}, {transform_indices = @transform_2, window_bounds = array<i64: 256, 1>}, {transform_indices = @transform_3, window_bounds = array<i64: 1, 128>}, {transform_indices = @transform_4, window_bounds = array<i64: 1, 128>}]} {
    %c0_i32 = arith.constant 0 : i32
    %0 = arith.cmpi eq, %arg1, %c0_i32 : i32
    %1 = arith.extui %0 : i1 to i32
    %c0_i32_0 = arith.constant 0 : i32
    %2 = arith.cmpi ne, %1, %c0_i32_0 : i32
    scf.if %2 {
      %cst_19 = arith.constant 0x7F800000 : f32
      %31 = vector.broadcast %cst_19 : f32 to vector<1x128xf32>
      %c0_20 = arith.constant 0 : index
      %c0_21 = arith.constant 0 : index
      %32 = vector.load %arg7[%c0_20, %c0_21] : memref<1x128xf32, #tpu.memory_space<vmem>>, vector<1x128xf32>
      tpu.vector_store %arg7[%c0_20, %c0_21], %31 {strides = array<i32>} : memref<1x128xf32, #tpu.memory_space<vmem>>, vector<1x128xf32>,
      %c0_i32_22 = arith.constant 0 : i32
      %33 = vector.broadcast %c0_i32_22 : i32 to vector<1x128xi32>
      %c0_23 = arith.constant 0 : index
      %c0_24 = arith.constant 0 : index
      %34 = vector.load %arg8[%c0_23, %c0_24] : memref<1x128xi32, #tpu.memory_space<vmem>>, vector<1x128xi32>
      tpu.vector_store %arg8[%c0_23, %c0_24], %33 {strides = array<i32>} : memref<1x128xi32, #tpu.memory_space<vmem>>, vector<1x128xi32>,
    } else {
    }
    %c0 = arith.constant 0 : index
    %c0_1 = arith.constant 0 : index
    %3 = vector.load %arg3[%c0, %c0_1] : memref<256x32xf32, #tpu.memory_space<vmem>>, vector<256x32xf32>
    %c0_2 = arith.constant 0 : index
    %c0_3 = arith.constant 0 : index
    %4 = vector.load %arg2[%c0_2, %c0_3] : memref<32x128xf32, #tpu.memory_space<vmem>>, vector<32x128xf32>
    %cst = arith.constant dense<0.000000e+00> : vector<256x128xf32>
    %5 = tpu.matmul %3, %4, %cst {dimension_numbers = #tpu.dot_dimension_numbers<[1], [0], [0], [1], [0, 0, 1, 1], [], []>} : vector<256x32xf32>, vector<32x128xf32>, vector<256x128xf32> -> vector<256x128xf32>
    %c0_4 = arith.constant 0 : index
    %c0_5 = arith.constant 0 : index
    %6 = vector.load %arg4[%c0_4, %c0_5] : memref<256x1xf32, #tpu.memory_space<vmem>>, vector<256x1xf32>
    %7 = vector.broadcast %6 : vector<256x1xf32> to vector<256x128xf32>
    %8 = arith.addf %5, %7 : vector<256x128xf32>
    %cst_6 = arith.constant dense<0x7F800000> : vector<128xf32>
    %9 = vector.multi_reduction <minimumf>, %8, %cst_6 [0] : vector<256x128xf32> to vector<128xf32>
    %10 = vector.shape_cast %9 : vector<128xf32> to vector<1x128xf32>
    %11 = tpu.iota {dimensions = array<i32: 0>} : vector<256x128xi32>
    %12 = vector.broadcast %10 : vector<1x128xf32> to vector<256x128xf32>
    %13 = arith.cmpf ole, %8, %12 : vector<256x128xf32>
    %c256_i32 = arith.constant 256 : i32
    %14 = vector.broadcast %c256_i32 : i32 to vector<256x128xi32>
    %15 = arith.select %13, %11, %14 : vector<256x128xi1>, vector<256x128xi32>
    %cst_7 = arith.constant dense<2147483647> : vector<128xi32>
    %16 = vector.multi_reduction <minsi>, %15, %cst_7 [0] : vector<256x128xi32> to vector<128xi32>
    %17 = vector.shape_cast %16 : vector<128xi32> to vector<1x128xi32>
    %c256_i32_8 = arith.constant 256 : i32
    %18 = arith.muli %arg1, %c256_i32_8 : i32
    %19 = vector.broadcast %18 : i32 to vector<1x128xi32>
    %20 = arith.addi %17, %19 : vector<1x128xi32>
    %c0_9 = arith.constant 0 : index
    %c0_10 = arith.constant 0 : index
    %21 = vector.load %arg7[%c0_9, %c0_10] : memref<1x128xf32, #tpu.memory_space<vmem>>, vector<1x128xf32>
    %c0_11 = arith.constant 0 : index
    %c0_12 = arith.constant 0 : index
    %22 = vector.load %arg8[%c0_11, %c0_12] : memref<1x128xi32, #tpu.memory_space<vmem>>, vector<1x128xi32>
    %23 = arith.cmpf olt, %10, %21 : vector<1x128xf32>
    %24 = arith.select %23, %20, %22 : vector<1x128xi1>, vector<1x128xi32>
    %c0_13 = arith.constant 0 : index
    %c0_14 = arith.constant 0 : index
    %25 = vector.load %arg8[%c0_13, %c0_14] : memref<1x128xi32, #tpu.memory_space<vmem>>, vector<1x128xi32>
    tpu.vector_store %arg8[%c0_13, %c0_14], %24 {strides = array<i32>} : memref<1x128xi32, #tpu.memory_space<vmem>>, vector<1x128xi32>,
    %26 = arith.select %23, %10, %21 : vector<1x128xi1>, vector<1x128xf32>
    %c0_15 = arith.constant 0 : index
    %c0_16 = arith.constant 0 : index
    %27 = vector.load %arg7[%c0_15, %c0_16] : memref<1x128xf32, #tpu.memory_space<vmem>>, vector<1x128xf32>
    tpu.vector_store %arg7[%c0_15, %c0_16], %26 {strides = array<i32>} : memref<1x128xf32, #tpu.memory_space<vmem>>, vector<1x128xf32>,
    %c0_i32_17 = arith.constant 0 : i32
    %28 = arith.cmpi eq, %arg1, %c0_i32_17 : i32
    %29 = arith.extui %28 : i1 to i32
    %c0_i32_18 = arith.constant 0 : i32
    %30 = arith.cmpi ne, %29, %c0_i32_18 : i32
    scf.if %30 {
      %c0_19 = arith.constant 0 : index
      %c0_20 = arith.constant 0 : index
      %31 = vector.load %arg8[%c0_19, %c0_20] : memref<1x128xi32, #tpu.memory_space<vmem>>, vector<1x128xi32>
      %c0_21 = arith.constant 0 : index
      %c0_22 = arith.constant 0 : index
      %32 = vector.load %arg6[%c0_21, %c0_22] : memref<1x128xi32, #tpu.memory_space<vmem>>, vector<1x128xi32>
      tpu.vector_store %arg6[%c0_21, %c0_22], %31 {strides = array<i32>} : memref<1x128xi32, #tpu.memory_space<vmem>>, vector<1x128xi32>,
    } else {
    }
    return
  }
  func.func @transform_0(%arg0: i32, %arg1: i32) -> (i32, i32) {
    %c0_i32 = arith.constant 0 : i32
    %c0_i32_0 = arith.constant 0 : i32
    return %c0_i32, %arg0 : i32, i32
  }
  func.func @transform_1(%arg0: i32, %arg1: i32) -> (i32, i32) {
    %c0_i32 = arith.constant 0 : i32
    %c0_i32_0 = arith.constant 0 : i32
    return %arg1, %c0_i32 : i32, i32
  }
  func.func @transform_2(%arg0: i32, %arg1: i32) -> (i32, i32) {
    %c0_i32 = arith.constant 0 : i32
    %c0_i32_0 = arith.constant 0 : i32
    return %arg1, %c0_i32 : i32, i32
  }
  func.func @transform_3(%arg0: i32, %arg1: i32) -> (i32, i32) {
    %c0_i32 = arith.constant 0 : i32
    %c0_i32_0 = arith.constant 0 : i32
    return %c0_i32, %arg0 : i32, i32
  }
  func.func @transform_4(%arg0: i32, %arg1: i32) -> (i32, i32) {
    %c0_i32 = arith.constant 0 : i32
    %c0_i32_0 = arith.constant 0 : i32
    return %c0_i32, %arg0 : i32, i32
  }
}

</mosaic_0001>

<bundles_post_ra>
// kernel: tpu_custom_call.1
= control target key start
LH: loop header
LB: loop body
LE: loop exit
PB: predicated region body
PF: predicated region fallthrough
CT: control target
= control target key end

     0   :  { %v774_v1 = vmov 0   ;;  %vm252_vm0 = vcmask 261120   ;;  %s1444_s0 = inlined_call_operand.vmem [shape: f32[32,128], index: 0, kind: input, shape index: {}]   ;;  %s1445_s1 = inlined_call_operand.vmem [shape: f32[256,32], index: 1, kind: input, shape index: {}]   ;;  %s1446_s2 = inlined_call_operand.vmem [shape: f32[256,1], index: 2, kind: input, shape index: {}]   ;;  %s1447_s3 = inlined_call_operand.vmem [shape: f32[1,128], index: 3, kind: input, shape index: {}]   ;;  %s1448_s4 = inlined_call_operand.hbm [shape: s32[1,128], index: 4, kind: output, shape index: {}]  }
   0x1   :  { %v59_v0 = vld [vmem:[%s1444_s0 + $0x18] sm:$0xff]  ;;  %23 = vst [vmem:[#allocation3] sm:$0x1] %v774_v1  ;;  %v64_v2 = vld [vmem:[%s1446_s2 + $0x20] sm:$0xff]  ;;  %v62_v3 = vld [vmem:[%s1446_s2 + $0x10] sm:$0xff]  ;;  %747 = vset.pattern.permute.xlu2 %v774_v1  ;;  %746 = vset.pattern.permute.xlu1 %v774_v1 }
   0x2   :  { %361 = vmatpush.msra.mxu0 %v59_v0  ;;  %730 = vmatpush.msra.mxu1 %v59_v0  ;;  %v60_v4 = vld [vmem:[%s1446_s2] sm:$0xff]  ;;  %v58_v5 = vld [vmem:[%s1444_s0 + $0x10] sm:$0xff]  ;;  %v57_v6 = vld [vmem:[%s1444_s0 + $0x8] sm:$0xff] }
   0x3   :  { %731 = vmatpush.msra.mxu2 %v59_v0  ;;  %732 = vmatpush.msra.mxu3 %v59_v0  ;;  %v56_v7 = vld [vmem:[%s1444_s0] sm:$0xff]  ;;  %v65_v12 = vld [vmem:[%s1446_s2 + $0x28] sm:$0xff]  ;;  %v63_v13 = vld [vmem:[%s1446_s2 + $0x18] sm:$0xff] }
   0x4   :  { %745 = vset.pattern.permute.xlu0 %v774_v1  ;;  %114 = vperm.xlu2 %747, %v64_v2   ;;  %v24_v8 = vld [vmem:[%s1445_s1] sm:$0xff]  ;;  %v61_v14 = vld [vmem:[%s1446_s2 + $0x8] sm:$0xff] }
   0x5   :  { %104 = vperm.xlu1 %746, %v62_v3   ;;  %94 = vperm.xlu0 %745, %v60_v4   ;;  %v32_v9 = vld [vmem:[%s1445_s1 + $0x40] sm:$0xff] }
   0x6   :  { %362 = vmatpush.msra.mxu0 %v58_v5  ;;  %733 = vmatpush.msra.mxu1 %v58_v5  ;;  %v40_v10 = vld [vmem:[%s1445_s1 + $0x80] sm:$0xff] }
   0x7   :  { %734 = vmatpush.msra.mxu2 %v58_v5  ;;  %735 = vmatpush.msra.mxu3 %v58_v5  ;;  %v48_v11 = vld [vmem:[%s1445_s1 + $0xc0] sm:$0xff] }
   0x8   :  { %363 = vmatpush.msra.mxu0 %v57_v6  ;;  %736 = vmatpush.msra.mxu1 %v57_v6 }
   0x9   :  { %737 = vmatpush.msra.mxu2 %v57_v6  ;;  %738 = vmatpush.msra.mxu3 %v57_v6 }
   0xa   :  { %364 = vmatpush.msra.mxu0 %v56_v7  ;;  %739 = vmatpush.msra.mxu1 %v56_v7 }
   0xb   :  { %740 = vmatpush.msra.mxu2 %v56_v7  ;;  %741 = vmatpush.msra.mxu3 %v56_v7 }
   0xc   :  { %698 = vmatmul.msk.f32.vlgmr.msra.gmra.mxu0 %vm252_vm0, %v24_v8  ;;  %706 = vmatmul.msk.f32.vlgmr.msra.gmra.mxu1 %vm252_vm0, %v32_v9 }
   0xd   :  { %714 = vmatmul.msk.f32.vlgmr.msra.gmra.mxu2 %vm252_vm0, %v40_v10  ;;  %722 = vmatmul.msk.f32.vlgmr.msra.gmra.mxu3 %vm252_vm0, %v48_v11 }
   0xe   :  { %9 = vsyncpa [#allocation5], 0  ;;  %119 = vperm.xlu2 %747, %v65_v12   ;;  %109 = vperm.xlu1 %746, %v63_v13   ;;  %v25_v15 = vld [vmem:[%s1445_s1 + $0x8] sm:$0xff]  ;;  %v68_v19 = vld [vmem:[%s1446_s2 + $0x40] sm:$0xff]  ;;  %s689_s13 = sshll.u32 %s1448_s4, 4  ;;  %s690_s13 = int_to_ptr.hbm [resolvable:$true] %s689_s13 }
   0xf   :  { %99 = vperm.xlu0 %745, %v61_v14   ;;  %v33_v16 = vld [vmem:[%s1445_s1 + $0x48] sm:$0xff]  ;;  %v67_v20 = vld [vmem:[%s1446_s2 + $0x38] sm:$0xff]  ;;  %v66_v21 = vld [vmem:[%s1446_s2 + $0x30] sm:$0xff] }
  0x10   :  { %v41_v17 = vld [vmem:[%s1445_s1 + $0x88] sm:$0xff]  ;;  %v26_v22 = vld [vmem:[%s1445_s1 + $0x10] sm:$0xff]  ;;  %v71_v26 = vld [vmem:[%s1446_s2 + $0x58] sm:$0xff] }
  0x11   :  { %v49_v18 = vld [vmem:[%s1445_s1 + $0xc8] sm:$0xff]  ;;  %v34_v23 = vld [vmem:[%s1445_s1 + $0x50] sm:$0xff]  ;;  %v27_v29 = vld [vmem:[%s1445_s1 + $0x18] sm:$0xff] }
  0x12   :  { %v42_v24 = vld [vmem:[%s1445_s1 + $0x90] sm:$0xff]  ;;  %v69_v28 = vld [vmem:[%s1446_s2 + $0x48] sm:$0xff]  ;;  %v35_v30 = vld [vmem:[%s1445_s1 + $0x58] sm:$0xff] }
  0x13   :  { %v50_v25 = vld [vmem:[%s1445_s1 + $0xd0] sm:$0xff]  ;;  %v43_v31 = vld [vmem:[%s1445_s1 + $0x98] sm:$0xff]  ;;  %v73_v34 = vld [vmem:[%s1446_s2 + $0x68] sm:$0xff] }
  0x14   :  { %699 = vmatmul.msk.f32.gmra.mxu0 %vm252_vm0, %v25_v15  ;;  %707 = vmatmul.msk.f32.gmra.mxu1 %vm252_vm0, %v33_v16  ;;  %v70_v27 = vld [vmem:[%s1446_s2 + $0x50] sm:$0xff]  ;;  %v51_v32 = vld [vmem:[%s1445_s1 + $0xd8] sm:$0xff]  ;;  %v72_v35 = vld [vmem:[%s1446_s2 + $0x60] sm:$0xff] }
  0x15   :  { %715 = vmatmul.msk.f32.gmra.mxu2 %vm252_vm0, %v41_v17  ;;  %723 = vmatmul.msk.f32.gmra.mxu3 %vm252_vm0, %v49_v18  ;;  %v74_v33 = vld [vmem:[%s1446_s2 + $0x70] sm:$0xff]  ;;  %v28_v36 = vld [vmem:[%s1445_s1 + $0x20] sm:$0xff]  ;;  %v77_v40 = vld [vmem:[%s1446_s2 + $0x88] sm:$0xff] }
  0x16   :  { %134 = vperm.xlu2 %747, %v68_v19   ;;  %129 = vperm.xlu1 %746, %v67_v20   ;;  %v36_v37 = vld [vmem:[%s1445_s1 + $0x60] sm:$0xff]  ;;  %v75_v42 = vld [vmem:[%s1446_s2 + $0x78] sm:$0xff]  ;;  %v29_v43 = vld [vmem:[%s1445_s1 + $0x28] sm:$0xff] }
  0x17   :  { %124 = vperm.xlu0 %745, %v66_v21   ;;  %v44_v38 = vld [vmem:[%s1445_s1 + $0xa0] sm:$0xff]  ;;  %v37_v44 = vld [vmem:[%s1445_s1 + $0x68] sm:$0xff]  ;;  %v79_v48 = vld [vmem:[%s1446_s2 + $0x98] sm:$0xff] }
  0x18   :  { %v52_v39 = vld [vmem:[%s1445_s1 + $0xe0] sm:$0xff]  ;;  %v45_v45 = vld [vmem:[%s1445_s1 + $0xa8] sm:$0xff]  ;;  %v78_v49 = vld [vmem:[%s1446_s2 + $0x90] sm:$0xff] }
  0x19   :  { %v76_v41 = vld [vmem:[%s1446_s2 + $0x80] sm:$0xff]  ;;  %v53_v46 = vld [vmem:[%s1445_s1 + $0xe8] sm:$0xff]  ;;  %v30_v50 = vld [vmem:[%s1445_s1 + $0x30] sm:$0xff] }
  0x1a   :  { %v80_v47 = vld [vmem:[%s1446_s2 + $0xa0] sm:$0xff]  ;;  %v38_v51 = vld [vmem:[%s1445_s1 + $0x70] sm:$0xff]  ;;  %v83_v54 = vld [vmem:[%s1446_s2 + $0xb8] sm:$0xff] }
  0x1b   :  { %v46_v52 = vld [vmem:[%s1445_s1 + $0xb0] sm:$0xff]  ;;  %v81_v56 = vld [vmem:[%s1446_s2 + $0xa8] sm:$0xff]  ;;  %v31_v57 = vld [vmem:[%s1445_s1 + $0x38] sm:$0xff] }
  0x1c   :  { %700 = vmatmul.msk.f32.gmra.mxu0 %vm252_vm0, %v26_v22  ;;  %708 = vmatmul.msk.f32.gmra.mxu1 %vm252_vm0, %v34_v23  ;;  %v54_v53 = vld [vmem:[%s1445_s1 + $0xf0] sm:$0xff]  ;;  %v39_v58 = vld [vmem:[%s1445_s1 + $0x78] sm:$0xff]  ;;  %v85_v62 = vld [vmem:[%s1446_s2 + $0xc8] sm:$0xff] }
  0x1d   :  { %716 = vmatmul.msk.f32.gmra.mxu2 %vm252_vm0, %v42_v24  ;;  %724 = vmatmul.msk.f32.gmra.mxu3 %vm252_vm0, %v50_v25  ;;  %v82_v55 = vld [vmem:[%s1446_s2 + $0xb0] sm:$0xff]  ;;  %v47_v59 = vld [vmem:[%s1445_s1 + $0xb8] sm:$0xff]  ;;  %v84_v63 = vld [vmem:[%s1446_s2 + $0xc0] sm:$0xff] }
  0x1e   :  { %149 = vperm.xlu2 %747, %v71_v26   ;;  %144 = vperm.xlu1 %746, %v70_v27   ;;  %v55_v60 = vld [vmem:[%s1445_s1 + $0xf8] sm:$0xff]  ;;  %v86_v61 = vld [vmem:[%s1446_s2 + $0xd0] sm:$0xff]  ;;  %v89_v0 = vld [vmem:[%s1446_s2 + $0xe8] sm:$0xff] }
  0x1f   :  { %139 = vperm.xlu0 %745, %v69_v28   ;;  %v88_v1 = vld [vmem:[%s1446_s2 + $0xe0] sm:$0xff]  ;;  %v87_v2 = vld [vmem:[%s1446_s2 + $0xd8] sm:$0xff]  ;;  %v90_v4 = vld [vmem:[%s1446_s2 + $0xf0] sm:$0xff] }
  0x20   :  { %v91_v3 = vld [vmem:[%s1446_s2 + $0xf8] sm:$0xff]  ;;  %s776_s2 = smov [#allocation4]  }
  0x21   :  { %s687_s10 = sshll.u32 %s776_s2, 4  ;;  %s688_s10 = int_to_ptr.vmem [resolvable:$true] %s687_s10 }
  0x24   :  { %701 = vmatmul.msk.f32.gmra.mxu0 %vm252_vm0, %v27_v29  ;;  %709 = vmatmul.msk.f32.gmra.mxu1 %vm252_vm0, %v35_v30 }
  0x25   :  { %717 = vmatmul.msk.f32.gmra.mxu2 %vm252_vm0, %v43_v31  ;;  %725 = vmatmul.msk.f32.gmra.mxu3 %vm252_vm0, %v51_v32 }
  0x26   :  { %164 = vperm.xlu2 %747, %v74_v33   ;;  %159 = vperm.xlu1 %746, %v73_v34  }
  0x27   :  { %154 = vperm.xlu0 %745, %v72_v35  }
  0x2c   :  { %702 = vmatmul.msk.f32.gmra.mxu0 %vm252_vm0, %v28_v36  ;;  %710 = vmatmul.msk.f32.gmra.mxu1 %vm252_vm0, %v36_v37 }
  0x2d   :  { %718 = vmatmul.msk.f32.gmra.mxu2 %vm252_vm0, %v44_v38  ;;  %726 = vmatmul.msk.f32.gmra.mxu3 %vm252_vm0, %v52_v39 }
  0x2e   :  { %179 = vperm.xlu2 %747, %v77_v40   ;;  %174 = vperm.xlu1 %746, %v76_v41  }
  0x2f   :  { %169 = vperm.xlu0 %745, %v75_v42  }
  0x34   :  { %703 = vmatmul.msk.f32.gmra.mxu0 %vm252_vm0, %v29_v43  ;;  %711 = vmatmul.msk.f32.gmra.mxu1 %vm252_vm0, %v37_v44 }
  0x35   :  { %719 = vmatmul.msk.f32.gmra.mxu2 %vm252_vm0, %v45_v45  ;;  %727 = vmatmul.msk.f32.gmra.mxu3 %vm252_vm0, %v53_v46 }
  0x36   :  { %194 = vperm.xlu2 %747, %v80_v47   ;;  %189 = vperm.xlu1 %746, %v79_v48  }
  0x37   :  { %184 = vperm.xlu0 %745, %v78_v49   ;;  %v775_v49 = vmov inf  }
  0x38   :  { %22 = vst [vmem:[#allocation2] sm:$0x1] %v775_v49 }
  0x3c   :  { %704 = vmatmul.msk.f32.gmra.mxu0 %vm252_vm0, %v30_v50  ;;  %712 = vmatmul.msk.f32.gmra.mxu1 %vm252_vm0, %v38_v51 }
  0x3d   :  { %720 = vmatmul.msk.f32.gmra.mxu2 %vm252_vm0, %v46_v52  ;;  %728 = vmatmul.msk.f32.gmra.mxu3 %vm252_vm0, %v54_v53 }
  0x3e   :  { %209 = vperm.xlu2 %747, %v83_v54   ;;  %204 = vperm.xlu1 %746, %v82_v55  }
  0x3f   :  { %199 = vperm.xlu0 %745, %v81_v56  }
  0x44   :  { %705 = vmatmul.msk.f32.gmra.mxu0 %vm252_vm0, %v31_v57  ;;  %713 = vmatmul.msk.f32.gmra.mxu1 %vm252_vm0, %v39_v58 }
  0x45   :  { %721 = vmatmul.msk.f32.gmra.mxu2 %vm252_vm0, %v47_v59  ;;  %729 = vmatmul.msk.f32.gmra.mxu3 %vm252_vm0, %v55_v60 }
  0x46   :  { %224 = vperm.xlu2 %747, %v86_v61   ;;  %219 = vperm.xlu1 %746, %v85_v62  }
  0x47   :  { %214 = vperm.xlu0 %745, %v84_v63  }
  0x4e   :  { %239 = vperm.xlu2 %747, %v89_v0   ;;  %234 = vperm.xlu1 %746, %v88_v1  }
  0x4f   :  { %229 = vperm.xlu0 %745, %v87_v2  }
  0x56   :  { %249 = vperm.xlu1 %746, %v91_v3  }
  0x57   :  { %244 = vperm.xlu0 %745, %v90_v4  }
  0x5e   :  { %v115_v5 = vpop.permute.xlu2 %114 }
  0x68   :  { %v120_v8 = vpop.permute.xlu2 %119 }
  0x70   :  { %v135_v11 = vpop.permute.xlu2 %134 }
  0x77   :  { %v105_v6 = vpop.permute.xlu1 %104  ;;  %v95_v7 = vpop.permute.xlu0 %94 }
  0x78   :  { %v1046_v18 = vpop.permute.xlu2 %149 }
  0x80   :  { %v1038_v9 = vpop.permute.xlu1 %109  ;;  %v165_v28 = vpop.permute.xlu2 %164 }
  0x81   :  { %v100_v10 = vpop.permute.xlu0 %99 }
  0x88   :  { %v1040_v12 = vpop.permute.xlu1 %129  ;;  %v180_v36 = vpop.permute.xlu2 %179 }
  0x89   :  { %v125_v13 = vpop.permute.xlu0 %124  ;;  %v366_v14 = vpop.f32.mrf.mxu0 }
  0x8a   :  { %v390_v15 = vpop.f32.mrf.mxu1  ;;  %v1068_v54 = vadd.f32 %v366_v14, %v95_v7 }
  0x8b   :  { %v1082_v3 = vadd.f32 %v390_v15, %v135_v11 }
  0x90   :  { %v1042_v16 = vpop.f32.mrf.mxu2  ;;  %v1044_v17 = vpop.f32.mrf.mxu3 }
  0x91   :  { %v145_v19 = vpop.permute.xlu1 %144  ;;  %v140_v20 = vpop.permute.xlu0 %139 }
  0x92   :  { %v369_v21 = vpop.f32.mrf.mxu0  ;;  %v393_v22 = vpop.f32.mrf.mxu1 }
  0x93   :  { %v195_v43 = vpop.permute.xlu2 %194  ;;  %v1066_v53 = vadd.f32 %v369_v21, %v100_v10  ;;  %v1076_v63 = vadd.f32 %v393_v22, %v140_v20 }
  0x98   :  { %v417_v23 = vpop.f32.mrf.mxu2  ;;  %v1048_v24 = vpop.f32.mrf.mxu3 }
  0x99   :  { %v160_v25 = vpop.permute.xlu1 %159  ;;  %v155_v26 = vpop.permute.xlu0 %154 }
  0x9a   :  { %v372_v27 = vpop.f32.mrf.mxu0  ;;  %v396_v29 = vpop.f32.mrf.mxu1 }
  0x9b   :  { %v210_v57 = vpop.permute.xlu2 %209  ;;  %v1078_v0 = vadd.f32 %v372_v27, %v105_v6  ;;  %v1084_v4 = vadd.f32 %v396_v29, %v145_v19  ;;  %v1099_v29 = vadd.f32 %v417_v23, %v180_v36 }
  0xa0   :  { %v420_v30 = vpop.f32.mrf.mxu2  ;;  %v1050_v31 = vpop.f32.mrf.mxu3 }
  0xa1   :  { %v175_v32 = vpop.permute.xlu1 %174  ;;  %v1052_v33 = vpop.permute.xlu0 %169 }
  0xa2   :  { %v375_v34 = vpop.f32.mrf.mxu0  ;;  %v399_v35 = vpop.f32.mrf.mxu1 }
  0xa3   :  { %v1112_v49 = vadd.f32 %v399_v35, %v1046_v18 }
  0xa8   :  { %v1054_v37 = vpop.f32.mrf.mxu2  ;;  %v1056_v38 = vpop.f32.mrf.mxu3 }
  0xa9   :  { %v1058_v39 = vpop.permute.xlu1 %189  ;;  %v185_v40 = vpop.permute.xlu0 %184 }
  0xaa   :  { %v378_v41 = vpop.f32.mrf.mxu0  ;;  %v402_v42 = vpop.f32.mrf.mxu1 }
  0xab   :  { %v1064_v52 = vadd.f32 %v378_v41, %v115_v5  ;;  %v1093_v6 = vadd.f32 %v402_v42, %v155_v26  ;;  %v225_v41 = vpop.permute.xlu2 %224 }
  0xad   :  { %v462_v60 = vmin.f32 %v1068_v54, %v1064_v52 }
  0xb0   :  { %v426_v44 = vpop.f32.mrf.mxu2  ;;  %v1060_v45 = vpop.f32.mrf.mxu3 }
  0xb1   :  { %v205_v46 = vpop.permute.xlu1 %204  ;;  %v200_v47 = vpop.permute.xlu0 %199  ;;  %v1127_v18 = vadd.f32 %v426_v44, %v195_v43 }
  0xb2   :  { %v381_v48 = vpop.f32.mrf.mxu0  ;;  %v405_v50 = vpop.f32.mrf.mxu1 }
  0xb3   :  { %v1062_v51 = vadd.f32 %v381_v48, %v120_v8  ;;  %v466_v8 = vmin.f32 %v462_v60, %v1082_v3  ;;  %v1090_v10 = vadd.f32 %v405_v50, %v160_v25  ;;  %v1102_v25 = vadd.f32 %v375_v34, %v1038_v9 }
  0xb4   :  { %v1114_v50 = vadd.f32 %v420_v30, %v185_v40  ;;  %v1134_v40 = vadd.f32 %v1054_v37, %v1058_v39  ;;  %v1152_v39 = vadd.f32 %v1050_v31, %v225_v41 }
  0xb5   :  { %v463_v58 = vmin.f32 %v1066_v53, %v1062_v51  ;;  %v470_v21 = vmin.f32 %v466_v8, %v1093_v6 }
  0xb7   :  { %v467_v5 = vmin.f32 %v463_v58, %v1076_v63 }
  0xb8   :  { %v429_v55 = vpop.f32.mrf.mxu2  ;;  %v1070_v56 = vpop.f32.mrf.mxu3 }
  0xb9   :  { %v220_v59 = vpop.permute.xlu1 %219  ;;  %v215_v61 = vpop.permute.xlu0 %214  ;;  %v471_v20 = vmin.f32 %v467_v5, %v1090_v10  ;;  %v1120_v36 = vadd.f32 %v429_v55, %v200_v47 }
  0xba   :  { %v384_v62 = vpop.f32.mrf.mxu0  ;;  %v408_v2 = vpop.f32.mrf.mxu1  ;;  %v1130_v30 = vadd.f32 %v1044_v17, %v215_v61  ;;  %v1142_v60 = vadd.f32 %v1048_v24, %v220_v59 }
  0xbb   :  { %v1080_v1 = vadd.f32 %v384_v62, %v125_v13  ;;  %v1096_v11 = vadd.f32 %v408_v2, %v165_v28  ;;  %v1109_v28 = vadd.f32 %v1042_v16, %v175_v32  ;;  %v475_v23 = vmin.f32 %v471_v20, %v1099_v29  ;;  %v240_v5 = vpop.permute.xlu2 %239 }
  0xbd   :  { %v464_v7 = vmin.f32 %v1078_v0, %v1080_v1  ;;  %v474_v34 = vmin.f32 %v470_v21, %v1109_v28  ;;  %v479_v47 = vmin.f32 %v475_v23, %v1120_v36  ;;  %v499_v21 = vlaneseq }
  0xbf   :  { %v468_v14 = vmin.f32 %v464_v7, %v1084_v4  ;;  %v483_v24 = vmin.f32 %v479_v47, %v1142_v60 }
  0xc0   :  { %v432_v13 = vpop.f32.mrf.mxu2  ;;  %v456_v15 = vpop.f32.mrf.mxu3 }
  0xc1   :  { %v235_v19 = vpop.permute.xlu1 %234  ;;  %v230_v22 = vpop.permute.xlu0 %229  ;;  %v472_v26 = vmin.f32 %v468_v14, %v1096_v11  ;;  %v1137_v55 = vadd.f32 %v432_v13, %v205_v46 }
  0xc2   :  { %v387_v27 = vpop.f32.mrf.mxu0  ;;  %v411_v48 = vpop.f32.mrf.mxu1  ;;  %v1146_v44 = vadd.f32 %v1060_v45, %v235_v19  ;;  %v1157_v59 = vadd.f32 %v1056_v38, %v230_v22 }
  0xc3   :  { %v1106_v42 = vadd.f32 %v387_v27, %v1040_v12  ;;  %v476_v12 = vmin.f32 %v472_v26, %v1114_v50  ;;  %v1124_v16 = vadd.f32 %v411_v48, %v1052_v33  ;;  %v478_v33 = vmin.f32 %v474_v34, %v1127_v18 }
  0xc5   :  { %v465_v9 = vmin.f32 %v1102_v25, %v1106_v42  ;;  %v480_v17 = vmin.f32 %v476_v12, %v1137_v55  ;;  %v482_v46 = vmin.f32 %v478_v33, %v1130_v30 }
  0xc7   :  { %v469_v32 = vmin.f32 %v465_v9, %v1112_v49  ;;  %v486_v31 = vmin.f32 %v482_v46, %v1146_v44  ;;  %v484_v13 = vmin.f32 %v480_v17, %v1152_v39 }
  0xc8   :  { %v435_v35 = vpop.f32.mrf.mxu2  ;;  %v459_v62 = vpop.f32.mrf.mxu3 }
  0xc9   :  { %v473_v58 = vmin.f32 %v469_v32, %v1124_v16  ;;  %v245_v43 = vpop.permute.xlu0 %244  ;;  %v1148_v61 = vadd.f32 %v435_v35, %v210_v57  ;;  %v250_v2 = vpop.permute.xlu1 %249  ;;  %v1163_v57 = vadd.f32 %v1070_v56, %v240_v5  ;;  %v1173_v56 = vshrl.u32 %v499_v21, 7 }
  0xca   :  { %v1160_v7 = vadd.f32 %v456_v15, %v245_v43  ;;  %v1166_v8 = vadd.f32 %v459_v62, %v250_v2 }
  0xcb   :  { %v477_v37 = vmin.f32 %v473_v58, %v1134_v40  ;;  %v487_v20 = vmin.f32 %v483_v24, %v1163_v57  ;;  %v1176_v48 = vadd.s32 64, %v1173_v56  ;;  %v1179_v23 = vadd.s32 8, %v1173_v56 }
  0xcc   :  { %1451 = vst [vmem:[#allocation7_spill] sm:$0xff] %v1160_v7  ;;  %v488_v19 = vmin.f32 %v484_v13, %v1160_v7  ;;  %v1182_v9 = vadd.s32 72, %v1173_v56  ;;  %v1185_v34 = vadd.s32 136, %v1173_v56  ;;  %v1188_v12 = vadd.s32 16, %v1173_v56 }
  0xcd   :  { %v481_v45 = vmin.f32 %v477_v37, %v1148_v61  ;;  %1452 = vst [vmem:[#allocation8_spill] sm:$0xff] %v1166_v8  ;;  %v490_v15 = vmin.f32 %v486_v31, %v487_v20  ;;  %v1191_v32 = vadd.s32 80, %v1173_v56  ;;  %v1194_v47 = vadd.s32 208, %v1173_v56 }
  0xce   :  { %v1197_v58 = vadd.s32 128, %v1173_v56  ;;  %v503_v33 = vadd.s32 24, %v1173_v56  ;;  %v1201_v43 = vadd.s32 88, %v1173_v56  ;;  %v1204_v17 = vadd.s32 152, %v1173_v56 }
  0xcf   :  { %v485_v14 = vmin.f32 %v481_v45, %v1157_v59  ;;  %1453 = vst [vmem:[#allocation9_spill] sm:$0xff] %v1194_v47  ;;  %v1207_v37 = vadd.s32 144, %v1173_v56  ;;  %v504_v46 = vadd.s32 32, %v1173_v56  ;;  %v1211_v2 = vadd.s32 96, %v1173_v56 }
  0xd0   :  { %v1214_v5 = vadd.s32 160, %v1173_v56  ;;  %v505_v24 = vadd.s32 40, %v1173_v56  ;;  %v513_v45 = vadd.s32 104, %v1173_v56  ;;  %v1219_v31 = vadd.s32 168, %v1173_v56 }
  0xd1   :  { %v489_v38 = vmin.f32 %v485_v14, %v1166_v8  ;;  %v1222_v14 = vadd.s32 232, %v1173_v56  ;;  %v1225_v13 = vadd.s32 200, %v1173_v56  ;;  %v514_v21 = vadd.s32 112, %v1173_v56 }
  0xd2   :  { %v1247_v47 = vadd.s32 248, %v1173_v56 }
  0xd3   :  { %v491_v22 = vmin.f32 %v488_v19, %v489_v38  ;;  %1454 = vst [vmem:[#allocation10_spill] sm:$0xff] %v1222_v14  ;;  %v1228_v38 = vadd.s32 192, %v1173_v56  ;;  %v506_v19 = vadd.s32 48, %v1173_v56  ;;  %v523_v14 = vadd.s32 184, %v1173_v56 }
  0xd4   :  { %1455 = vst [vmem:[#allocation11_spill] sm:$0xff] %v1225_v13  ;;  %v1250_v13 = vadd.s32 240, %v1173_v56 }
  0xd5   :  { %v492_v27 = vmin.f32 %v490_v15, %v491_v22  ;;  %v1233_v15 = vadd.s32 176, %v1173_v56  ;;  %v1236_v22 = vadd.s32 224, %v1173_v56  ;;  %1456 = vst [vmem:[#allocation12_spill] sm:$0xff] %v1247_v47 }
  0xd7   :  { %v493_v41 = vrot.slane %v492_v27, 4 }
  0xd9   :  { %v494_v26 = vmin.f32 %v492_v27, %v493_v41  ;;  %v1239_v27 = vadd.s32 216, %v1173_v56  ;;  %v507_v41 = vadd.s32 56, %v1173_v56 }
  0xdb   :  { %v495_v35 = vrot.slane %v494_v26, 2 }
  0xdd   :  { %v496_v62 = vmin.f32 %v494_v26, %v495_v35  ;;  %v515_v35 = vadd.s32 120, %v1173_v56 }
  0xdf   :  { %v497_v20 = vrot.slane %v496_v62, 1 }
  0xe1   :  { %v1242_v26 = vmin.f32 %v496_v62, %v497_v20 }
  0xe3   :  { %vm532_vm1 = vcmp.le.f32.partialorder %v1068_v54, %v1242_v26  ;;  %vm533_vm2 = vcmp.le.f32.partialorder %v1066_v53, %v1242_v26  ;;  %vm534_vm3 = vcmp.le.f32.partialorder %v1078_v0, %v1242_v26  ;;  %vm535_vm4 = vcmp.le.f32.partialorder %v1102_v25, %v1242_v26 }
  0xe4   :  { %vm536_vm5 = vcmp.le.f32.partialorder %v1064_v52, %v1242_v26  ;;  %vm537_vm6 = vcmp.le.f32.partialorder %v1062_v51, %v1242_v26  ;;  %vm538_vm7 = vcmp.le.f32.partialorder %v1080_v1, %v1242_v26  ;;  %vm539_vm8 = vcmp.le.f32.partialorder %v1106_v42, %v1242_v26 }
  0xe5   :  { %vm540_vm9 = vcmp.le.f32.partialorder %v1082_v3, %v1242_v26  ;;  %vm557_vm12 = vcmp.le.f32.partialorder %v1142_v60, %v1242_v26  ;;  %vm558_vm13 = vcmp.le.f32.partialorder %v1152_v39, %v1242_v26  ;;  %vm559_vm14 = vcmp.le.f32.partialorder %v1157_v59, %v1242_v26 }
  0xe6   :  { %vm560_vm15 = vcmp.le.f32.partialorder %v1146_v44, %v1242_v26  ;;  %vm561_vm0 = vcmp.le.f32.partialorder %v1163_v57, %v1242_v26  ;;  %vm562_vm10 = vcmp.le.f32.partialorder %v1160_v7, %v1242_v26  ;;  %vm563_vm11 = vcmp.le.f32.partialorder %v1166_v8, %v1242_v26 }
  0xe7   :  { %v564_v62 = vsel %vm532_vm1, %v1173_v56, 256  ;;  %v565_v20 = vsel %vm533_vm2, %v1179_v23, 256  ;;  %v566_v47 = vsel %vm534_vm3, %v1188_v12, 256  ;;  %v567_v7 = vsel %vm535_vm4, %v503_v33, 256  ;;  %v1474_v56 = vld [vmem:[#allocation9_spill] sm:$0xff] }
  0xe8   :  { %v568_v8 = vsel %vm536_vm5, %v504_v46, 256  ;;  %v569_v54 = vsel %vm537_vm6, %v505_v24, 256  ;;  %v570_v53 = vsel %vm538_vm7, %v506_v19, 256  ;;  %v571_v0 = vsel %vm539_vm8, %v507_v41, 256 }
  0xe9   :  { %v572_v25 = vsel %vm540_vm9, %v1176_v48, 256  ;;  %vm1457_vm1 = vcmp.le.f32.partialorder %v1076_v63, %v1242_v26  ;;  %vm1458_vm2 = vcmp.le.f32.partialorder %v1084_v4, %v1242_v26  ;;  %vm1459_vm3 = vcmp.le.f32.partialorder %v1112_v49, %v1242_v26  ;;  %v1475_v48 = vld [vmem:[#allocation10_spill] sm:$0xff] }
  0xea   :  { %v573_v52 = vsel %vm1457_vm1, %v1182_v9, 256  ;;  %v574_v51 = vsel %vm1458_vm2, %v1191_v32, 256  ;;  %v575_v1 = vsel %vm1459_vm3, %v1201_v43, 256  ;;  %vm1460_vm4 = vcmp.le.f32.partialorder %v1093_v6, %v1242_v26  ;;  %v1477_v9 = vld [vmem:[#allocation12_spill] sm:$0xff] }
  0xeb   :  { %v576_v3 = vsel %vm1460_vm4, %v1211_v2, 256  ;;  %vm1461_vm5 = vcmp.le.f32.partialorder %v1090_v10, %v1242_v26  ;;  %vm1462_vm6 = vcmp.le.f32.partialorder %v1096_v11, %v1242_v26  ;;  %vm1463_vm7 = vcmp.le.f32.partialorder %v1124_v16, %v1242_v26 }
  0xec   :  { %v577_v63 = vsel %vm1461_vm5, %v513_v45, 256  ;;  %v578_v42 = vsel %vm1462_vm6, %v514_v21, 256  ;;  %v579_v4 = vsel %vm1463_vm7, %v515_v35, 256  ;;  %vm1464_vm8 = vcmp.le.f32.partialorder %v1109_v28, %v1242_v26 }
  0xed   :  { %v580_v49 = vsel %vm1464_vm8, %v1197_v58, 256  ;;  %vm1465_vm9 = vcmp.le.f32.partialorder %v1099_v29, %v1242_v26  ;;  %vm1466_vm1 = vcmp.le.f32.partialorder %v1114_v50, %v1242_v26  ;;  %vm1467_vm2 = vcmp.le.f32.partialorder %v1134_v40, %v1242_v26  ;;  %v1473_v40 = vld [vmem:[#allocation11_spill] sm:$0xff] }
  0xee   :  { %v581_v6 = vsel %vm1465_vm9, %v1185_v34, 256  ;;  %v582_v10 = vsel %vm1466_vm1, %v1207_v37, 256  ;;  %v583_v11 = vsel %vm1467_vm2, %v1204_v17, 256  ;;  %vm1468_vm3 = vcmp.le.f32.partialorder %v1127_v18, %v1242_v26 }
  0xef   :  { %v584_v28 = vsel %vm1468_vm3, %v1214_v5, 256  ;;  %vm1469_vm4 = vcmp.le.f32.partialorder %v1120_v36, %v1242_v26  ;;  %vm1470_vm5 = vcmp.le.f32.partialorder %v1137_v55, %v1242_v26  ;;  %vm1471_vm6 = vcmp.le.f32.partialorder %v1148_v61, %v1242_v26 }
  0xf0   :  { %v585_v29 = vsel %vm1469_vm4, %v1219_v31, 256  ;;  %v586_v50 = vsel %vm1470_vm5, %v1233_v15, 256  ;;  %v587_v16 = vsel %vm1471_vm6, %v523_v14, 256  ;;  %vm1472_vm7 = vcmp.le.f32.partialorder %v1130_v30, %v1242_v26 }
  0xf1   :  { %v588_v18 = vsel %vm1472_vm7, %v1228_v38, 256  ;;  %v589_v36 = vsel %vm557_vm12, %v1473_v40, 256  ;;  %v590_v55 = vsel %vm558_vm13, %v1474_v56, 256  ;;  %v591_v61 = vsel %vm559_vm14, %v1239_v27, 256 }
  0xf2   :  { %v592_v30 = vsel %vm560_vm15, %v1236_v22, 256  ;;  %v593_v60 = vsel %vm561_vm0, %v1475_v48, 256  ;;  %v594_v39 = vsel %vm562_vm10, %v1250_v13, 256  ;;  %v595_v59 = vsel %vm563_vm11, %v1477_v9, 256  ;;  %v670_v22 = vld [vmem:[#allocation2] sm:$0x1] }
  0xf3   :  { %vm596_vm12 = vcmp.lt.s32.totalorder %v564_v62, %v568_v8  ;;  %vm598_vm13 = vcmp.lt.s32.totalorder %v565_v20, %v569_v54  ;;  %vm600_vm14 = vcmp.lt.s32.totalorder %v566_v47, %v570_v53  ;;  %vm602_vm8 = vcmp.lt.s32.totalorder %v567_v7, %v571_v0 }
  0xf4   :  { %v597_v44 = vsel %vm596_vm12, %v564_v62, %v568_v8  ;;  %v599_v12 = vsel %vm598_vm13, %v565_v20, %v569_v54  ;;  %v601_v32 = vsel %vm600_vm14, %v566_v47, %v570_v53  ;;  %v603_v58 = vsel %vm602_vm8, %v567_v7, %v571_v0 }
  0xf5   :  { %vm604_vm15 = vcmp.lt.s32.totalorder %v597_v44, %v572_v25  ;;  %vm606_vm0 = vcmp.lt.s32.totalorder %v599_v12, %v573_v52  ;;  %vm608_vm9 = vcmp.lt.s32.totalorder %v601_v32, %v574_v51  ;;  %vm610_vm1 = vcmp.lt.s32.totalorder %v603_v58, %v575_v1 }
  0xf6   :  { %v605_v57 = vsel %vm604_vm15, %v597_v44, %v572_v25  ;;  %v607_v33 = vsel %vm606_vm0, %v599_v12, %v573_v52  ;;  %v609_v43 = vsel %vm608_vm9, %v601_v32, %v574_v51  ;;  %v611_v17 = vsel %vm610_vm1, %v603_v58, %v575_v1 }
  0xf7   :  { %vm612_vm10 = vcmp.lt.s32.totalorder %v605_v57, %v576_v3  ;;  %vm614_vm2 = vcmp.lt.s32.totalorder %v607_v33, %v577_v63  ;;  %vm616_vm3 = vcmp.lt.s32.totalorder %v609_v43, %v578_v42  ;;  %vm618_vm11 = vcmp.lt.s32.totalorder %v611_v17, %v579_v4 }
  0xf8   :  { %v613_v37 = vsel %vm612_vm10, %v605_v57, %v576_v3  ;;  %v615_v46 = vsel %vm614_vm2, %v607_v33, %v577_v63  ;;  %v617_v2 = vsel %vm616_vm3, %v609_v43, %v578_v42  ;;  %v619_v5 = vsel %vm618_vm11, %v611_v17, %v579_v4  ;;  %v671_v63 = vld [vmem:[#allocation3] sm:$0x1] }
  0xf9   :  { %vm620_vm4 = vcmp.lt.s32.totalorder %v613_v37, %v580_v49  ;;  %vm622_vm5 = vcmp.lt.s32.totalorder %v615_v46, %v581_v6  ;;  %vm624_vm6 = vcmp.lt.s32.totalorder %v617_v2, %v582_v10  ;;  %vm626_vm7 = vcmp.lt.s32.totalorder %v619_v5, %v583_v11 }
  0xfa   :  { %v621_v7 = vsel %vm620_vm4, %v613_v37, %v580_v49  ;;  %v623_v8 = vsel %vm622_vm5, %v615_v46, %v581_v6  ;;  %v625_v47 = vsel %vm624_vm6, %v617_v2, %v582_v10  ;;  %v627_v24 = vsel %vm626_vm7, %v619_v5, %v583_v11 }
  0xfb   :  { %vm628_vm12 = vcmp.lt.s32.totalorder %v621_v7, %v584_v28  ;;  %vm630_vm13 = vcmp.lt.s32.totalorder %v623_v8, %v585_v29  ;;  %vm632_vm14 = vcmp.lt.s32.totalorder %v625_v47, %v586_v50  ;;  %vm634_vm8 = vcmp.lt.s32.totalorder %v627_v24, %v587_v16 }
  0xfc   :  { %v629_v45 = vsel %vm628_vm12, %v621_v7, %v584_v28  ;;  %v631_v31 = vsel %vm630_vm13, %v623_v8, %v585_v29  ;;  %v633_v14 = vsel %vm632_vm14, %v625_v47, %v586_v50  ;;  %v635_v13 = vsel %vm634_vm8, %v627_v24, %v587_v16 }
  0xfd   :  { %vm636_vm15 = vcmp.lt.s32.totalorder %v629_v45, %v588_v18  ;;  %vm638_vm0 = vcmp.lt.s32.totalorder %v631_v31, %v589_v36  ;;  %vm640_vm9 = vcmp.lt.s32.totalorder %v633_v14, %v590_v55  ;;  %vm642_vm1 = vcmp.lt.s32.totalorder %v635_v13, %v591_v61 }
  0xfe   :  { %v637_v38 = vsel %vm636_vm15, %v629_v45, %v588_v18  ;;  %v639_v19 = vsel %vm638_vm0, %v631_v31, %v589_v36  ;;  %v641_v21 = vsel %vm640_vm9, %v633_v14, %v590_v55  ;;  %v643_v15 = vsel %vm642_vm1, %v635_v13, %v591_v61 }
  0xff   :  { %vm644_vm10 = vcmp.lt.s32.totalorder %v637_v38, %v592_v30  ;;  %vm646_vm2 = vcmp.lt.s32.totalorder %v639_v19, %v593_v60  ;;  %vm648_vm3 = vcmp.lt.s32.totalorder %v641_v21, %v594_v39  ;;  %vm650_vm11 = vcmp.lt.s32.totalorder %v643_v15, %v595_v59 }
 0x100   :  { %v645_v27 = vsel %vm644_vm10, %v637_v38, %v592_v30  ;;  %v647_v41 = vsel %vm646_vm2, %v639_v19, %v593_v60  ;;  %v649_v35 = vsel %vm648_vm3, %v641_v21, %v594_v39  ;;  %v651_v62 = vsel %vm650_vm11, %v643_v15, %v595_v59 }
 0x101   :  { %vm652_vm4 = vcmp.lt.s32.totalorder %v645_v27, %v647_v41  ;;  %vm654_vm5 = vcmp.lt.s32.totalorder %v649_v35, %v651_v62  ;;  %vm672_vm6 = vcmp.lt.f32.partialorder %v1242_v26, %v670_v22 }
 0x102   :  { %v653_v20 = vsel %vm652_vm4, %v645_v27, %v647_v41  ;;  %v655_v54 = vsel %vm654_vm5, %v649_v35, %v651_v62  ;;  %v675_v53 = vsel %vm672_vm6, %v1242_v26, %v670_v22 }
 0x103   :  { %vm656_vm7 = vcmp.lt.s32.totalorder %v653_v20, %v655_v54  ;;  %676 = vst [vmem:[#allocation2] sm:$0x1] %v675_v53 }
 0x104   :  { %v657_v0 = vsel %vm656_vm7, %v653_v20, %v655_v54 }
 0x105   :  { %v658_v25 = vrot.slane %v657_v0, 4 }
 0x107   :  { %vm659_vm12 = vcmp.lt.s32.totalorder %v657_v0, %v658_v25 }
 0x108   :  { %v660_v52 = vsel %vm659_vm12, %v657_v0, %v658_v25 }
 0x109   :  { %v661_v51 = vrot.slane %v660_v52, 2 }
 0x10b   :  { %vm662_vm13 = vcmp.lt.s32.totalorder %v660_v52, %v661_v51 }
 0x10c   :  { %v663_v1 = vsel %vm662_vm13, %v660_v52, %v661_v51 }
 0x10d   :  { %v664_v3 = vrot.slane %v663_v1, 1 }
 0x10f   :  { %vm665_vm14 = vcmp.lt.s32.totalorder %v663_v1, %v664_v3 }
 0x110   :  { %v666_v42 = vsel %vm665_vm14, %v663_v1, %v664_v3 }
 0x111   :  { %v673_v4 = vsel %vm672_vm6, %v666_v42, %v671_v63 }
 0x112   :  { %674 = vst [vmem:[#allocation3] sm:$0x1] %v673_v4 }
 0x119   :  { %v680_v49 = vld [vmem:[#allocation3] sm:$0x1] }
 0x11a   :  { %681 = vst [vmem:[#allocation4] sm:$0x1] %v680_v49 }
 0x11b   :  { %692 = dma.vmem_to_hbm [thread:$0]  %s688_s10, 16, %s690_s13, [#allocation5]  }
 0x11c   :  { %772 = dma.done.wait [#allocation5], 16  }
 0x11d   :  { %773 = vsyncadd [#allocation5], 4294967280 }
 0x11e   :  { %697 = vsyncpa [#allocation5], 1 }

</bundles_post_ra>
